<compile_context>
chip_gen: v6e
topology: v6e:2x2x1
jax: 0.10.0
libtpu: 0.0.40
codegen_flags: <defaults>
</compile_context>

<pallas_src>
import jax
import jax.numpy as jnp
import numpy as np
from jax.experimental import pallas as pl
from jax.experimental.pallas import tpu as pltpu

_HEAD_ROWS = 8            # row 0 = mu, row 1 = sigma, rows 2..7 = zero padding
_LEAKY_SLOPE = 0.01
_SOFTPLUS_THRESHOLD = 20.0


def _alpha_kernel(x_ref, w1_ref, b1_ref, wh_ref, bh_ref, out_ref):
    """One column tile: x_ref is (H, tm), out_ref is (_HEAD_ROWS, tm)."""
    x_t = x_ref[...]                                                    # (H, tm) bf16
    # linear1 (transposed): h^T = W1^T @ x^T   -> MXU, f32 accumulate
    h = jnp.dot(w1_ref[...], x_t, preferred_element_type=jnp.float32)   # (H, tm) f32
    h = h + b1_ref[...]                                                 # (H, 1) lane-broadcast
    h = jnp.maximum(h, _LEAKY_SLOPE * h)                                # LeakyReLU
    # fused mu/sigma heads: (8, H) @ (H, tm) -> (8, tm)
    heads = jnp.dot(wh_ref[...], h.astype(wh_ref.dtype),
                    preferred_element_type=jnp.float32)
    z = heads + bh_ref[...]                                             # (8, 1) lane-broadcast
    # Softplus (beta=1, threshold=20); row 0 (mu) keeps its linear value.
    sp = jnp.where(z > _SOFTPLUS_THRESHOLD, z,
                   jnp.log1p(jnp.exp(jnp.minimum(z, _SOFTPLUS_THRESHOLD))))
    row = jax.lax.broadcasted_iota(jnp.int32, z.shape, 0)
    out_ref[...] = jnp.where(row == 0, z, sp).astype(out_ref.dtype)


def alpha_layer(x, w1, b1, w_mu, b_mu, w_sigma, b_sigma, *,
                tm=None, compute_dtype=jnp.bfloat16):
    """AlphaLayer forward.  Weights use the (in, out) convention: y = x @ W + b."""
    N, H = x.shape

    # ---- tile size: one grid step when small; 512-wide lane-dense parallel
    # tiles (multiple of 128) for real-sized N.
    if tm is None:
        tm = N if N <= 1024 else 512
    if tm >= N:
        tm = N
    else:
        tm = max(128, (tm // 128) * 128)
    n_pad = -(-N // tm) * tm
    grid = (n_pad // tm,)

    # ---- layout plumbing (outside the kernel): transpose / fuse / cast.
    x_t = jnp.transpose(x)                                              # (H, N)
    if n_pad != N:
        x_t = jnp.pad(x_t, ((0, 0), (0, n_pad - N)))
    x_t = x_t.astype(compute_dtype)
    w1_t = jnp.transpose(w1).astype(compute_dtype)                      # (H, H)
    b1_col = jnp.reshape(b1, (H, 1)).astype(jnp.float32)                # (H, 1)
    w_heads_t = jnp.transpose(jnp.concatenate([w_mu, w_sigma], axis=1))  # (2, H)
    w_heads_t = jnp.pad(w_heads_t,
                        ((0, _HEAD_ROWS - 2), (0, 0))).astype(compute_dtype)
    b_heads = jnp.concatenate([jnp.reshape(b_mu, (1,)),
                               jnp.reshape(b_sigma, (1,))])
    b_heads = jnp.pad(b_heads, (0, _HEAD_ROWS - 2))                     # (8,)
    b_heads_col = jnp.reshape(b_heads, (_HEAD_ROWS, 1)).astype(jnp.float32)

    full = lambda i: (0, 0)
    coltile = lambda i: (0, i)

    out = pl.pallas_call(
        _alpha_kernel,
        out_shape=jax.ShapeDtypeStruct((_HEAD_ROWS, n_pad), jnp.float32),
        grid_spec=pltpu.PrefetchScalarGridSpec(
            num_scalar_prefetch=0,
            grid=grid,
            in_specs=[
                pl.BlockSpec((H, tm), coltile),                        # x^T column tile
                pl.BlockSpec((H, H), full),                            # W1^T
                pl.BlockSpec((H, 1), full),                            # b1 column
                pl.BlockSpec((_HEAD_ROWS, H), full),                   # fused head weights
                pl.BlockSpec((_HEAD_ROWS, 1), full),                   # fused head biases
            ],
            out_specs=pl.BlockSpec((_HEAD_ROWS, tm), coltile),         # lane-dense slab
        ),
        compiler_params=pltpu.CompilerParams(
            dimension_semantics=("parallel",)),
    )(x_t, w1_t, b1_col, w_heads_t, b_heads_col)

    mu = jnp.reshape(out[0, :N], (N, 1)).astype(x.dtype)
    sigma = jnp.reshape(out[1, :N], (N, 1)).astype(x.dtype)
    return mu, sigma


def _reference(x, w1, b1, w_mu, b_mu, w_sigma, b_sigma,
               compute_dtype=jnp.bfloat16):
    """Pure-JAX reference mirroring the kernel's bf16-operand / f32-accum math."""
    cd = compute_dtype
    h = jnp.dot(x.astype(cd), w1.astype(cd),
                preferred_element_type=jnp.float32) + b1
    h = jnp.maximum(h, _LEAKY_SLOPE * h)
    w_heads = jnp.concatenate([w_mu, w_sigma], axis=1).astype(cd)
    heads = jnp.dot(h.astype(cd), w_heads, preferred_element_type=jnp.float32)
    mu = heads[:, :1] + b_mu
    sg = heads[:, 1:2] + b_sigma
    sp = jnp.where(sg > _SOFTPLUS_THRESHOLD, sg,
                   jnp.log1p(jnp.exp(jnp.minimum(sg, _SOFTPLUS_THRESHOLD))))
    return mu, sp


if __name__ == "__main__":
    N, H = 64, 32   # 64 stocks, hidden_dim = 32
    key = jax.random.PRNGKey(0)
    kx, k1, k2, k3, k4, k5, k6 = jax.random.split(key, 7)

    # nn.Linear-style init: uniform in +/- 1/sqrt(fan_in); weights stored (in, out).
    lim = 1.0 / np.sqrt(H)
    x       = jax.random.normal(kx, (N, H), dtype=jnp.float32)
    w1      = jax.random.uniform(k1, (H, H), jnp.float32, -lim, lim)
    b1      = jax.random.uniform(k2, (1, H), jnp.float32, -lim, lim)
    w_mu    = jax.random.uniform(k3, (H, 1), jnp.float32, -lim, lim)
    b_mu    = jax.random.uniform(k4, (1, 1), jnp.float32, -lim, lim)
    w_sigma = jax.random.uniform(k5, (H, 1), jnp.float32, -lim, lim)
    b_sigma = jax.random.uniform(k6, (1, 1), jnp.float32, -lim, lim)

    mu, sigma = alpha_layer(x, w1, b1, w_mu, b_mu, w_sigma, b_sigma)
    jax.block_until_ready((mu, sigma))

    mu_ref, sigma_ref = _reference(x, w1, b1, w_mu, b_mu, w_sigma, b_sigma)
    np.testing.assert_allclose(np.asarray(mu), np.asarray(mu_ref),
                               atol=1e-4, rtol=1e-4)
    np.testing.assert_allclose(np.asarray(sigma), np.asarray(sigma_ref),
                               atol=1e-4, rtol=1e-4)

    print("KERNEL_OK")
</pallas_src>

<mosaic_0001>
module attributes {stable_mosaic.version = 11 : i64} {
  func.func @_alpha_kernel(%arg0: i32, %arg1: memref<32x64xbf16, #tpu.memory_space<vmem>>, %arg2: memref<32x32xbf16, #tpu.memory_space<vmem>>, %arg3: memref<32x1xf32, #tpu.memory_space<vmem>>, %arg4: memref<8x32xbf16, #tpu.memory_space<vmem>>, %arg5: memref<8x1xf32, #tpu.memory_space<vmem>>, %arg6: memref<8x64xf32, #tpu.memory_space<vmem>>) attributes {dimension_semantics = [#tpu.dimension_semantics<parallel>], iteration_bounds = array<i64: 1>, scalar_prefetch = 0 : i64, scratch_operands = 0 : i64, tpu.core_type = #tpu.core_type<tc>, window_params = [{transform_indices = @transform_0, window_bounds = array<i64: 32, 64>}, {pipeline_mode = #tpu.pipeline_mode<synchronous>, transform_indices = @transform_1, window_bounds = array<i64: 32, 32>}, {pipeline_mode = #tpu.pipeline_mode<synchronous>, transform_indices = @transform_2, window_bounds = array<i64: 32, 1>}, {pipeline_mode = #tpu.pipeline_mode<synchronous>, transform_indices = @transform_3, window_bounds = array<i64: 8, 32>}, {pipeline_mode = #tpu.pipeline_mode<synchronous>, transform_indices = @transform_4, window_bounds = array<i64: 8, 1>}, {transform_indices = @transform_5, window_bounds = array<i64: 8, 64>}]} {
    %c0 = arith.constant 0 : index
    %c0_0 = arith.constant 0 : index
    %0 = vector.load %arg1[%c0, %c0_0] : memref<32x64xbf16, #tpu.memory_space<vmem>>, vector<32x64xbf16>
    %c0_1 = arith.constant 0 : index
    %c0_2 = arith.constant 0 : index
    %1 = vector.load %arg2[%c0_1, %c0_2] : memref<32x32xbf16, #tpu.memory_space<vmem>>, vector<32x32xbf16>
    %cst = arith.constant dense<0.000000e+00> : vector<32x64xf32>
    %2 = tpu.matmul %1, %0, %cst {dimension_numbers = #tpu.dot_dimension_numbers<[1], [0], [0], [1], [0, 0, 1, 1], [], []>} : vector<32x32xbf16>, vector<32x64xbf16>, vector<32x64xf32> -> vector<32x64xf32>
    %c0_3 = arith.constant 0 : index
    %c0_4 = arith.constant 0 : index
    %3 = vector.load %arg3[%c0_3, %c0_4] : memref<32x1xf32, #tpu.memory_space<vmem>>, vector<32x1xf32>
    %4 = vector.broadcast %3 : vector<32x1xf32> to vector<32x64xf32>
    %5 = arith.addf %2, %4 : vector<32x64xf32>
    %cst_5 = arith.constant 0.00999999977 : f32
    %6 = vector.broadcast %cst_5 : f32 to vector<32x64xf32>
    %7 = arith.mulf %6, %5 : vector<32x64xf32>
    %8 = arith.maximumf %5, %7 : vector<32x64xf32>
    %c0_6 = arith.constant 0 : index
    %c0_7 = arith.constant 0 : index
    %9 = vector.load %arg4[%c0_6, %c0_7] : memref<8x32xbf16, #tpu.memory_space<vmem>>, vector<8x32xbf16>
    %10 = arith.truncf %8 : vector<32x64xf32> to vector<32x64xbf16>
    %cst_8 = arith.constant dense<0.000000e+00> : vector<8x64xf32>
    %11 = tpu.matmul %9, %10, %cst_8 {dimension_numbers = #tpu.dot_dimension_numbers<[1], [0], [0], [1], [0, 0, 1, 1], [], []>} : vector<8x32xbf16>, vector<32x64xbf16>, vector<8x64xf32> -> vector<8x64xf32>
    %c0_9 = arith.constant 0 : index
    %c0_10 = arith.constant 0 : index
    %12 = vector.load %arg5[%c0_9, %c0_10] : memref<8x1xf32, #tpu.memory_space<vmem>>, vector<8x1xf32>
    %13 = vector.broadcast %12 : vector<8x1xf32> to vector<8x64xf32>
    %14 = arith.addf %11, %13 : vector<8x64xf32>
    %cst_11 = arith.constant 2.000000e+01 : f32
    %15 = vector.broadcast %cst_11 : f32 to vector<8x64xf32>
    %16 = arith.cmpf ogt, %14, %15 : vector<8x64xf32>
    %cst_12 = arith.constant 2.000000e+01 : f32
    %17 = vector.broadcast %cst_12 : f32 to vector<8x64xf32>
    %18 = arith.minimumf %14, %17 : vector<8x64xf32>
    %19 = math.exp %18 : vector<8x64xf32>
    %20 = math.log1p %19 : vector<8x64xf32>
    %21 = arith.select %16, %14, %20 : vector<8x64xi1>, vector<8x64xf32>
    %22 = tpu.iota {dimensions = array<i32: 0>} : vector<8x64xi32>
    %c0_i32 = arith.constant 0 : i32
    %23 = vector.broadcast %c0_i32 : i32 to vector<8x64xi32>
    %24 = arith.cmpi eq, %22, %23 : vector<8x64xi32>
    %25 = arith.select %24, %14, %21 : vector<8x64xi1>, vector<8x64xf32>
    %c0_13 = arith.constant 0 : index
    %c0_14 = arith.constant 0 : index
    %26 = vector.load %arg6[%c0_13, %c0_14] : memref<8x64xf32, #tpu.memory_space<vmem>>, vector<8x64xf32>
    tpu.vector_store %arg6[%c0_13, %c0_14], %25 {strides = array<i32>} : memref<8x64xf32, #tpu.memory_space<vmem>>, vector<8x64xf32>,
    return
  }
  func.func @transform_0(%arg0: i32) -> (i32, i32) {
    %c0_i32 = arith.constant 0 : i32
    %c0_i32_0 = arith.constant 0 : i32
    return %c0_i32, %arg0 : i32, i32
  }
  func.func @transform_1(%arg0: i32) -> (i32, i32) {
    %c0_i32 = arith.constant 0 : i32
    %c0_i32_0 = arith.constant 0 : i32
    %c0_i32_1 = arith.constant 0 : i32
    return %c0_i32, %c0_i32_0 : i32, i32
  }
  func.func @transform_2(%arg0: i32) -> (i32, i32) {
    %c0_i32 = arith.constant 0 : i32
    %c0_i32_0 = arith.constant 0 : i32
    %c0_i32_1 = arith.constant 0 : i32
    return %c0_i32, %c0_i32_0 : i32, i32
  }
  func.func @transform_3(%arg0: i32) -> (i32, i32) {
    %c0_i32 = arith.constant 0 : i32
    %c0_i32_0 = arith.constant 0 : i32
    %c0_i32_1 = arith.constant 0 : i32
    return %c0_i32, %c0_i32_0 : i32, i32
  }
  func.func @transform_4(%arg0: i32) -> (i32, i32) {
    %c0_i32 = arith.constant 0 : i32
    %c0_i32_0 = arith.constant 0 : i32
    %c0_i32_1 = arith.constant 0 : i32
    return %c0_i32, %c0_i32_0 : i32, i32
  }
  func.func @transform_5(%arg0: i32) -> (i32, i32) {
    %c0_i32 = arith.constant 0 : i32
    %c0_i32_0 = arith.constant 0 : i32
    return %c0_i32, %arg0 : i32, i32
  }
}

</mosaic_0001>

<bundles_post_ra>
// kernel: tpu_custom_call.1
= control target key start
LH: loop header
LB: loop body
LE: loop exit
PB: predicated region body
PF: predicated region fallthrough
CT: control target
= control target key end

     0   :  { %vm76_vm0 = vcmask 261120   ;;  %v292_v3 = vmov 0   ;;  %s362_s0 = inlined_call_operand.vmem [shape: bf16[32,64], index: 0, kind: input, shape index: {}]   ;;  %s363_s1 = inlined_call_operand.vmem [shape: bf16[32,32], index: 1, kind: input, shape index: {}]   ;;  %s364_s2 = inlined_call_operand.vmem [shape: f32[32,1], index: 2, kind: input, shape index: {}]   ;;  %s365_s3 = inlined_call_operand.vmem [shape: bf16[8,32], index: 3, kind: input, shape index: {}]   ;;  %s366_s4 = inlined_call_operand.vmem [shape: f32[8,1], index: 4, kind: input, shape index: {}]   ;;  %s367_s5 = inlined_call_operand.hbm [shape: f32[8,64], index: 5, kind: output, shape index: {}]  }
   0x1   :  { %v262_v0 = vld [vmem:[%s362_s0 + $0x8] sm:$0xff]   ;;  %v263_v1 = vld [vmem:[%s362_s0] sm:$0xff]   ;;  %260 = vset.pattern.permute.xlu0 %v292_v3  ;;  %261 = vset.pattern.permute.xlu1 %v292_v3  ;;  %v32_v4 = vld [vmem:[%s364_s2 + $0x10] sm:$0xff] }
   0x2   :  { %240 = vmatprep.subr.bf16.mxu0 %v262_v0  ;;  %v264_v2 = vld [vmem:[%s363_s1] sm:$0xff]   ;;  %46 = vperm.xlu0 %260, %v32_v4  }
   0x3   :  { %241 = vmatpush3.bf16.msra.mxu0 %v262_v0  ;;  %244 = vmatprep.mubr.msk.bf16.mxu0 %vm76_vm0, %v264_v2  ;;  %v30_v5 = vld [vmem:[%s364_s2] sm:$0xff] }
   0x4   :  { %242 = vmatprep.subr.bf16.mxu0 %v263_v1 }
   0x5   :  { %10 = vsyncpa [#allocation3], 0  ;;  %v265_v6 = vld [vmem:[%s363_s1 + $0x8] sm:$0xff]   ;;  %v33_v7 = vld [vmem:[%s364_s2 + $0x18] sm:$0xff]  ;;  %36 = vperm.xlu1 %261, %v30_v5   ;;  %v293_v10 = vmov 0.0   ;;  %vm294_vm1 = vmmov 0   ;;  %v206_v45 = vlaneseq }
   0x6   :  { %v31_v8 = vld [vmem:[%s364_s2 + $0x8] sm:$0xff]  ;;  %51 = vperm.xlu0 %260, %v33_v7   ;;  %v143_v9 = vld [vmem:[%s366_s4] sm:$0xff]  ;;  %248 = vmatprep.subr.bf16.mxu1 %v293_v10  ;;  %vm210_vm5 = vcmask 523264  }
   0x7   :  { %243 = vmatpush3.bf16.msra.mxu0 %v263_v1  ;;  %252 = vmatprep.mubr.msk.bf16.mxu1 %vm294_vm1, %v293_v10  ;;  %v140_v33 = vld [vmem:[%s365_s3] sm:$0xf]  ;;  %v207_v48 = vshrl.u32 %v206_v45, 7  ;;  %s295_s3 = smov [#allocation2]  }
   0x8   :  { %s218_s4 = sshll.u32 %s295_s3, 4  ;;  %s219_s4 = int_to_ptr.vmem [resolvable:$true] %s218_s4 }
   0x9   :  { %41 = vperm.xlu1 %261, %v31_v8   ;;  %vm208_vm3 = vcmp.eq.s32.totalorder %v207_v48, 0  ;;  %s270_s10 = scalar_lea.vmem %s219_s4, 128  ;;  %p275_p1 = scmp.lt.s32.totalorder %s219_s4, %s219_s4 }
   0xa   :  { %245 = vmatmul.mubr.msk.bf16.vlgmr.msra.gmra.mxu0 %vm76_vm0, %v265_v6  ;;  %146 = vperm.xlu0 %260, %v143_v9   ;;  %p271_p0 = scmp.ne.s32.totalorder %s219_s4, %s270_s10  ;;  %p276_p2 = scmp.lt.s32.totalorder %s270_s10, %s270_s10 }
   0xc   :  { %p277_p3 = por %p276_p2, %p275_p1 }
   0xe   :  { %p278_p4 = pnand %p277_p3, %p271_p0 }
  0x7d   :  { %v47_v11 = vpop.permute.xlu0 %46 }
  0x80   :  { %v37_v12 = vpop.permute.xlu1 %36 }
  0x81   :  { %v52_v16 = vpop.permute.xlu0 %51 }
  0x84   :  { %v42_v21 = vpop.permute.xlu1 %41 }
  0x85   :  { %v147_v34 = vpop.permute.xlu0 %146 }
  0xca   :  { %v246_v13 = vpop.f32.mrf.mxu0 }
  0xcb   :  { %v126_v14 = vadd.f32 %v246_v13, %v47_v11 }
  0xcc   :  { %v117_v15 = vpop.f32.mrf.mxu0 }
  0xcd   :  { %v134_v18 = vmul.f32 0.01, %v126_v14  ;;  %v118_v19 = vadd.f32 %v117_v15, %v37_v12 }
  0xce   :  { %v247_v17 = vpop.f32.mrf.mxu0 }
  0xcf   :  { %v129_v20 = vadd.f32 %v247_v17, %v52_v16  ;;  %v138_v25 = vmax.f32 %v126_v14, %v134_v18  ;;  %v132_v26 = vmul.f32 0.01, %v118_v19 }
  0xd0   :  { %v120_v22 = vpop.f32.mrf.mxu0 }
  0xd1   :  { %v135_v23 = vmul.f32 0.01, %v129_v20  ;;  %v121_v24 = vadd.f32 %v120_v22, %v42_v21  ;;  %v136_v31 = vmax.f32 %v118_v19, %v132_v26 }
  0xd3   :  { %v139_v27 = vmax.f32 %v129_v20, %v135_v23  ;;  %v133_v28 = vmul.f32 0.01, %v121_v24 }
  0xd5   :  { %v137_v29 = vmax.f32 %v121_v24, %v133_v28  ;;  %v142_v30 = vpack.c.bf16 %v139_v27, %v138_v25 }
  0xd7   :  { %249 = vmatpush3.bf16.msra.mxu1 %v142_v30  ;;  %v141_v32 = vpack.c.bf16 %v137_v29, %v136_v31 }
  0xd8   :  { %250 = vmatprep.subr.bf16.mxu1 %v293_v10 }
  0xdb   :  { %251 = vmatpush3.bf16.msra.mxu1 %v141_v32 }
  0xde   :  { %253 = vmatmul.mubr.msk.bf16.vlgmr.msra.gmra.mxu1 %vm76_vm0, %v140_v33 }
 0x19e   :  { %v186_v35 = vpop.f32.mrf.mxu1 }
 0x19f   :  { %v187_v36 = vadd.f32 %v186_v35, %v147_v34 }
 0x1a0   :  { %v254_v37 = vpop.f32.mrf.mxu1 }
 0x1a1   :  { %v193_v38 = vmin.f32 %v187_v36, 20.0  ;;  %vm192_vm4 = vcmp.gt.f32.partialorder %v187_v36, 20.0 }
 0x1a2   :  { %v189_v39 = vpop.f32.mrf.mxu1 }
 0x1a3   :  { %v194_v40 = vmul.f32 1.442695, %v193_v38 }
 0x1a4   :  { %v255_v41 = vpop.f32.mrf.mxu1 }
 0x1a5   :  { %266 = vpow2.f32 %v194_v40 }
 0x1b2   :  { %v267_v42 = vpop.eup %266 }
 0x1b3   :  { %v196_v43 = vadd.f32 1.0, %v267_v42  ;;  %v199_v44 = vmul.f32 -0.5, %v267_v42  ;;  %v202_v47 = vand.u32 2147483647, %v267_v42 }
 0x1b5   :  { %268 = vlog2.f32 %v196_v43  ;;  %v200_v46 = vadd.f32 1.0, %v199_v44  ;;  %vm203_vm2 = vcmp.lt.f32.partialorder %v202_v47, 0.0004427343 }
 0x1b7   :  { %v201_v51 = vmul.f32 %v267_v42, %v200_v46 }
 0x1c2   :  { %v269_v49 = vpop.eup %268 }
 0x1c3   :  { %v198_v50 = vmul.f32 0.6931472, %v269_v49 }
 0x1c5   :  { %v204_v52 = vsel %vm203_vm2, %v201_v51, %v198_v50 }
 0x1c6   :  { %v205_v53 = vsel %vm192_vm4, %v187_v36, %v204_v52 }
 0x1c7   :  { %v209_v54 = vsel %vm208_vm3, %v187_v36, %v205_v53 }
 0x1c8   :  { %211 = vst.msk [vmem:[#allocation2] sm:$0xff] %vm210_vm5, %v209_v54 }
 0x1c9   :  { %281 = shalt.err (!%p278_p4)
}
 0x1ca   :  { %221 = dma.vmem_to_hbm [thread:$0]  %s219_s4, 128, %s367_s5, [#allocation3]  }
 0x1cb   :  { %290 = dma.done.wait [#allocation3], 128  }
 0x1cc   :  { %291 = vsyncadd [#allocation3], 4294967168 }
 0x1cd   :  { %225 = vsyncpa [#allocation3], 1 }

</bundles_post_ra>
